<compile_context>
chip_gen: v5e
topology: v5e:2x2
jax: 0.10.0
libtpu: 0.0.40
codegen_flags: <defaults>
</compile_context>

<pallas_src>
import jax
import jax.numpy as jnp
from jax.experimental import pallas as pl
from jax.experimental.pallas import tpu as pltpu


def cf_kernel(uidx_ref, midx_ref, utab_ref, mtab_ref, o_ref):
    """One batch tile of TB (user, movie) pairs.

    uidx_ref / midx_ref : (1, TB)        int32  -- indices, batch on lanes
    utab_ref            : (2*E_pad, U)   bf16   -- user table, transposed,
                                                   hi half stacked over lo half,
                                                   biases folded into padded rows
    mtab_ref            : (2*E_pad, M)   bf16   -- movie table, same layout
    o_ref               : (1, TB)        f32    -- ratings (lane-dense block)
    """
    tb = uidx_ref.shape[1]
    n_users = utab_ref.shape[1]
    n_movies = mtab_ref.shape[1]
    e_pad = utab_ref.shape[0] // 2

    uidx = uidx_ref[...]          # (1, TB)
    midx = midx_ref[...]          # (1, TB)

    # One-hot selection masks with the batch on the lane axis:
    # onehot[r, j] == 1.0 iff idx[j] == r.  Built directly as bf16 (no f32
    # (rows, TB) intermediates).
    u_onehot = (jax.lax.broadcasted_iota(jnp.int32, (n_users, tb), 0)
                == uidx).astype(jnp.bfloat16)                       # (U, TB)
    m_onehot = (jax.lax.broadcasted_iota(jnp.int32, (n_movies, tb), 0)
                == midx).astype(jnp.bfloat16)                       # (M, TB)

    # MXU gather: single (2E, rows) @ (rows, TB) matmul per side, f32 acc.
    ug = jnp.dot(utab_ref[...], u_onehot, preferred_element_type=jnp.float32)
    mg = jnp.dot(mtab_ref[...], m_onehot, preferred_element_type=jnp.float32)

    # hi + lo halves reconstruct the f32 table rows (no cross terms: the two
    # halves are summed BEFORE the elementwise product / reduction).
    ue = ug[:e_pad, :] + ug[e_pad:, :]                               # (E, TB)
    me = mg[:e_pad, :] + mg[e_pad:, :]                               # (E, TB)

    # Interaction sum over the embedding dim.  The folded bias rows contribute
    # user_bias * 1.0 and 1.0 * movie_bias, so this is the full rating.
    o_ref[...] = jnp.sum(ue * me, axis=0, keepdims=True)            # (1, TB)


def prepare_cf_tables(user_emb, movie_emb, user_bias, movie_bias):
    """One-time (parameter-load-time) packing of the CF tables.

    Returns two (2*E_pad, rows) bf16 tables: transposed, hi/lo split along the
    leading axis, with user_bias folded into row `emb` (paired with a 1.0 row
    in the movie table) and movie_bias into row `emb+1` (1.0 row in the user
    table).  Do NOT call this per forward pass.
    """
    n_users, emb = user_emb.shape
    n_movies = movie_emb.shape[0]
    # +2 bias rows; pad to a multiple of 16 (bf16 sublane packing).  emb=50 -> 64,
    # so the stacked hi/lo table is exactly 128 rows.
    e_pad = 16 * pl.cdiv(emb + 2, 16)
    ub_row, mb_row = emb, emb + 1

    def pack(table, rows, bias_vals, bias_r, ones_r):
        t = jnp.zeros((e_pad, rows), jnp.float32)
        t = t.at[:emb, :].set(table.astype(jnp.float32).T)
        t = t.at[bias_r, :].set(bias_vals)
        t = t.at[ones_r, :].set(1.0)          # exact in bf16, lo half becomes 0
        hi = t.astype(jnp.bfloat16)
        lo = (t - hi.astype(jnp.float32)).astype(jnp.bfloat16)
        return jnp.concatenate([hi, lo], axis=0)     # (2*e_pad, rows)

    u_tab = pack(user_emb, n_users,
                 user_bias.reshape(-1).astype(jnp.float32),
                 bias_r=ub_row, ones_r=mb_row)
    m_tab = pack(movie_emb, n_movies,
                 movie_bias.reshape(-1).astype(jnp.float32),
                 bias_r=mb_row, ones_r=ub_row)
    return u_tab, m_tab


def _cf_call(tb, num_tiles, b_pad, e2, n_users, n_movies, vmem_limit,
             single_buffer_tables):
    idx_spec = pl.BlockSpec((1, tb), lambda i: (0, i))

    def resident(shape):
        if single_buffer_tables:
            # Constant index_map -> no need to double-buffer the tables.
            return pl.BlockSpec(shape, lambda i: (0, 0),
                                pipeline_mode=pl.Buffered(1))
        return pl.BlockSpec(shape, lambda i: (0, 0))

    return pl.pallas_call(
        cf_kernel,
        out_shape=jax.ShapeDtypeStruct((1, b_pad), jnp.float32),
        grid=(num_tiles,),
        in_specs=[
            idx_spec, idx_spec,
            resident((e2, n_users)),
            resident((e2, n_movies)),
        ],
        out_specs=pl.BlockSpec((1, tb), lambda i: (0, i)),
        compiler_params=pltpu.CompilerParams(
            dimension_semantics=("parallel",),   # batch tiles are independent
            vmem_limit_bytes=vmem_limit,
        ),
    )


def collaborative_filtering_fwd(user, movie, u_tab, m_tab, *, batch_tile=512):
    """Forward pass given pre-packed tables from `prepare_cf_tables`."""
    B = user.shape[0]
    e2, n_users = u_tab.shape
    n_movies = m_tab.shape[1]

    # Resident-table budget check (each TC holds its own copy under "parallel";
    # v7x has 64 MiB VMEM per TC).  See the TODO at the top for the DMA-gather
    # path that removes this limit.
    table_bytes = 2 * (int(u_tab.size) + int(m_tab.size))     # bf16
    if table_bytes > 24 * 1024 * 1024:
        raise NotImplementedError(
            "Embedding tables too large for the VMEM-resident one-hot gather; "
            "use the scalar-prefetch DMA row-gather path (see TODO).")

    # Right-size the batch tile: multiple of 128 lanes, no larger than needed.
    tb = min(batch_tile, 128 * pl.cdiv(B, 128))
    tb = 128 * pl.cdiv(tb, 128)
    num_tiles = pl.cdiv(B, tb)
    b_pad = num_tiles * tb
    pad = b_pad - B

    # Indices as lane-dense (1, B_pad) int32 streams.  Padding indexes row 0;
    # those outputs are discarded below.
    uidx = jnp.pad(user.astype(jnp.int32), (0, pad)).reshape(1, b_pad)
    midx = jnp.pad(movie.astype(jnp.int32), (0, pad)).reshape(1, b_pad)

    # Explicit VMEM limit: single-buffered tables + per-tile intermediates
    # (bf16 one-hots, f32 (2E, TB) gathers, idx/out blocks), with 2x headroom.
    per_tile = (2 * tb * (n_users + n_movies)       # bf16 one-hots
                + 4 * tb * 2 * e2                   # f32 gathered tiles (x2 sides)
                + 4 * tb * 8)                       # idx / out blocks
    vmem_limit = int(min(max(2 * (table_bytes + per_tile), 8 << 20), 56 << 20))

    args = (uidx, midx, u_tab, m_tab)
    try:
        out = _cf_call(tb, num_tiles, b_pad, e2, n_users, n_movies,
                       vmem_limit, single_buffer_tables=True)(*args)
    except Exception:
        # Fallback if this JAX/Mosaic build rejects pl.Buffered(1): identical
        # kernel with default (double-buffered) resident specs.
        out = _cf_call(tb, num_tiles, b_pad, e2, n_users, n_movies,
                       vmem_limit, single_buffer_tables=False)(*args)

    # torch: rating.squeeze() -> (B,) for B > 1, scalar for B == 1.
    return jnp.squeeze(out[0, :B])


def collaborative_filtering(user, movie, user_emb, movie_emb,
                            user_bias, movie_bias, *, batch_tile=512):
    """Convenience wrapper matching CollaborativeFiltering.forward(user, movie).

    For repeated calls with static weights, call `prepare_cf_tables` once and
    use `collaborative_filtering_fwd` directly (table packing is hoisted out
    of the per-call path).
    """
    u_tab, m_tab = prepare_cf_tables(user_emb, movie_emb, user_bias, movie_bias)
    return collaborative_filtering_fwd(user, movie, u_tab, m_tab,
                                       batch_tile=batch_tile)


if __name__ == "__main__":
    # Small, deterministic setup consistent with the module's __init__/forward.
    num_users, num_movies, embedding_size, batch = 64, 128, 50, 8

    key = jax.random.PRNGKey(0)
    k1, k2, k3, k4, k5, k6 = jax.random.split(key, 6)

    # nn.init.normal_(weight, 0, 0.1) for embeddings.  The module initializes
    # the bias tables to 0; use small non-zero biases here so the folded bias
    # path is actually exercised.
    user_emb = (0.1 * jax.random.normal(k1, (num_users, embedding_size))).astype(jnp.float32)
    movie_emb = (0.1 * jax.random.normal(k2, (num_movies, embedding_size))).astype(jnp.float32)
    user_bias = (0.1 * jax.random.normal(k5, (num_users, 1))).astype(jnp.float32)
    movie_bias = (0.1 * jax.random.normal(k6, (num_movies, 1))).astype(jnp.float32)

    user = jax.random.randint(k3, (batch,), 0, num_users, dtype=jnp.int32)
    movie = jax.random.randint(k4, (batch,), 0, num_movies, dtype=jnp.int32)

    # Pack tables once (parameter-load time), then run the forward pass.
    u_tab, m_tab = prepare_cf_tables(user_emb, movie_emb, user_bias, movie_bias)
    u_tab, m_tab = jax.block_until_ready((u_tab, m_tab))

    rating = collaborative_filtering_fwd(user, movie, u_tab, m_tab)
    rating = jax.block_until_ready(rating)

    # Pure-JAX reference for correctness.
    ref = (jnp.sum(user_emb[user] * movie_emb[movie], axis=1)
           + user_bias[user, 0] + movie_bias[movie, 0])
    assert rating.shape == (batch,), rating.shape
    assert jnp.allclose(rating, ref, atol=1e-4, rtol=1e-4), (rating, ref)

    print("KERNEL_OK")
</pallas_src>

<mosaic_0001>
module attributes {stable_mosaic.version = 11 : i64} {
  func.func @cf_kernel(%arg0: i32, %arg1: memref<1x128xi32, #tpu.memory_space<vmem>>, %arg2: memref<1x128xi32, #tpu.memory_space<vmem>>, %arg3: memref<128x64xbf16, #tpu.memory_space<vmem>>, %arg4: memref<128x128xbf16, #tpu.memory_space<vmem>>, %arg5: memref<1x128xf32, #tpu.memory_space<vmem>>) attributes {dimension_semantics = [#tpu.dimension_semantics<parallel>], iteration_bounds = array<i64: 1>, scalar_prefetch = 0 : i64, scratch_operands = 0 : i64, tpu.core_type = #tpu.core_type<tc>, window_params = [{transform_indices = @transform_0, window_bounds = array<i64: 1, 128>}, {transform_indices = @transform_1, window_bounds = array<i64: 1, 128>}, {pipeline_mode = #tpu.pipeline_mode<synchronous>, transform_indices = @transform_2, window_bounds = array<i64: 128, 64>}, {pipeline_mode = #tpu.pipeline_mode<synchronous>, transform_indices = @transform_3, window_bounds = array<i64: 128, 128>}, {transform_indices = @transform_4, window_bounds = array<i64: 1, 128>}]} {
    %c0 = arith.constant 0 : index
    %c0_0 = arith.constant 0 : index
    %0 = vector.load %arg1[%c0, %c0_0] : memref<1x128xi32, #tpu.memory_space<vmem>>, vector<1x128xi32>
    %c0_1 = arith.constant 0 : index
    %c0_2 = arith.constant 0 : index
    %1 = vector.load %arg2[%c0_1, %c0_2] : memref<1x128xi32, #tpu.memory_space<vmem>>, vector<1x128xi32>
    %2 = tpu.iota {dimensions = array<i32: 0>} : vector<64x128xi32>
    %3 = vector.broadcast %0 : vector<1x128xi32> to vector<64x128xi32>
    %4 = arith.cmpi eq, %2, %3 : vector<64x128xi32>
    %5 = arith.extui %4 : vector<64x128xi1> to vector<64x128xi32>
    %6 = arith.sitofp %5 : vector<64x128xi32> to vector<64x128xf32>
    %7 = arith.truncf %6 : vector<64x128xf32> to vector<64x128xbf16>
    %8 = tpu.iota {dimensions = array<i32: 0>} : vector<128x128xi32>
    %9 = vector.broadcast %1 : vector<1x128xi32> to vector<128x128xi32>
    %10 = arith.cmpi eq, %8, %9 : vector<128x128xi32>
    %11 = arith.extui %10 : vector<128x128xi1> to vector<128x128xi32>
    %12 = arith.sitofp %11 : vector<128x128xi32> to vector<128x128xf32>
    %13 = arith.truncf %12 : vector<128x128xf32> to vector<128x128xbf16>
    %c0_3 = arith.constant 0 : index
    %c0_4 = arith.constant 0 : index
    %14 = vector.load %arg3[%c0_3, %c0_4] : memref<128x64xbf16, #tpu.memory_space<vmem>>, vector<128x64xbf16>
    %cst = arith.constant dense<0.000000e+00> : vector<128x128xf32>
    %15 = tpu.matmul %14, %7, %cst {dimension_numbers = #tpu.dot_dimension_numbers<[1], [0], [0], [1], [0, 0, 1, 1], [], []>} : vector<128x64xbf16>, vector<64x128xbf16>, vector<128x128xf32> -> vector<128x128xf32>
    %c0_5 = arith.constant 0 : index
    %c0_6 = arith.constant 0 : index
    %16 = vector.load %arg4[%c0_5, %c0_6] : memref<128x128xbf16, #tpu.memory_space<vmem>>, vector<128x128xbf16>
    %cst_7 = arith.constant dense<0.000000e+00> : vector<128x128xf32>
    %17 = tpu.matmul %16, %13, %cst_7 {dimension_numbers = #tpu.dot_dimension_numbers<[1], [0], [0], [1], [0, 0, 1, 1], [], []>} : vector<128x128xbf16>, vector<128x128xbf16>, vector<128x128xf32> -> vector<128x128xf32>
    %18 = vector.extract_strided_slice %15 {offsets = [0, 0], sizes = [64, 128], strides = [1, 1]} : vector<128x128xf32> to vector<64x128xf32>
    %19 = vector.extract_strided_slice %15 {offsets = [64, 0], sizes = [64, 128], strides = [1, 1]} : vector<128x128xf32> to vector<64x128xf32>
    %20 = arith.addf %18, %19 : vector<64x128xf32>
    %21 = vector.extract_strided_slice %17 {offsets = [0, 0], sizes = [64, 128], strides = [1, 1]} : vector<128x128xf32> to vector<64x128xf32>
    %22 = vector.extract_strided_slice %17 {offsets = [64, 0], sizes = [64, 128], strides = [1, 1]} : vector<128x128xf32> to vector<64x128xf32>
    %23 = arith.addf %21, %22 : vector<64x128xf32>
    %24 = arith.mulf %20, %23 : vector<64x128xf32>
    %cst_8 = arith.constant dense<0.000000e+00> : vector<128xf32>
    %25 = vector.multi_reduction <add>, %24, %cst_8 [0] : vector<64x128xf32> to vector<128xf32>
    %26 = vector.shape_cast %25 : vector<128xf32> to vector<1x128xf32>
    %c0_9 = arith.constant 0 : index
    %c0_10 = arith.constant 0 : index
    %27 = vector.load %arg5[%c0_9, %c0_10] : memref<1x128xf32, #tpu.memory_space<vmem>>, vector<1x128xf32>
    tpu.vector_store %arg5[%c0_9, %c0_10], %26 {strides = array<i32>} : memref<1x128xf32, #tpu.memory_space<vmem>>, vector<1x128xf32>,
    return
  }
  func.func @transform_0(%arg0: i32) -> (i32, i32) {
    %c0_i32 = arith.constant 0 : i32
    %c0_i32_0 = arith.constant 0 : i32
    return %c0_i32, %arg0 : i32, i32
  }
  func.func @transform_1(%arg0: i32) -> (i32, i32) {
    %c0_i32 = arith.constant 0 : i32
    %c0_i32_0 = arith.constant 0 : i32
    return %c0_i32, %arg0 : i32, i32
  }
  func.func @transform_2(%arg0: i32) -> (i32, i32) {
    %c0_i32 = arith.constant 0 : i32
    %c0_i32_0 = arith.constant 0 : i32
    %c0_i32_1 = arith.constant 0 : i32
    return %c0_i32, %c0_i32_0 : i32, i32
  }
  func.func @transform_3(%arg0: i32) -> (i32, i32) {
    %c0_i32 = arith.constant 0 : i32
    %c0_i32_0 = arith.constant 0 : i32
    %c0_i32_1 = arith.constant 0 : i32
    return %c0_i32, %c0_i32_0 : i32, i32
  }
  func.func @transform_4(%arg0: i32) -> (i32, i32) {
    %c0_i32 = arith.constant 0 : i32
    %c0_i32_0 = arith.constant 0 : i32
    return %c0_i32, %arg0 : i32, i32
  }
}

module attributes {stable_mosaic.version = 11 : i64} {
  func.func @cf_kernel(%arg0: i32, %arg1: memref<1x128xi32, #tpu.memory_space<vmem>>, %arg2: memref<1x128xi32, #tpu.memory_space<vmem>>, %arg3: memref<128x64xbf16, #tpu.memory_space<vmem>>, %arg4: memref<128x128xbf16, #tpu.memory_space<vmem>>, %arg5: memref<1x128xf32, #tpu.memory_space<vmem>>) attributes {dimension_semantics = [#tpu.dimension_semantics<parallel>], iteration_bounds = array<i64: 1>, scalar_prefetch = 0 : i64, scratch_operands = 0 : i64, tpu.core_type = #tpu.core_type<tc>, window_params = [{transform_indices = @transform_0, window_bounds = array<i64: 1, 128>}, {transform_indices = @transform_1, window_bounds = array<i64: 1, 128>}, {pipeline_mode = #tpu.pipeline_mode<synchronous>, transform_indices = @transform_2, window_bounds = array<i64: 128, 64>}, {pipeline_mode = #tpu.pipeline_mode<synchronous>, transform_indices = @transform_3, window_bounds = array<i64: 128, 128>}, {transform_indices = @transform_4, window_bounds = array<i64: 1, 128>}]} {
    %c0 = arith.constant 0 : index
    %c0_0 = arith.constant 0 : index
    %0 = vector.load %arg1[%c0, %c0_0] : memref<1x128xi32, #tpu.memory_space<vmem>>, vector<1x128xi32>
    %c0_1 = arith.constant 0 : index
    %c0_2 = arith.constant 0 : index
    %1 = vector.load %arg2[%c0_1, %c0_2] : memref<1x128xi32, #tpu.memory_space<vmem>>, vector<1x128xi32>
    %2 = tpu.iota {dimensions = array<i32: 0>} : vector<64x128xi32>
    %3 = vector.broadcast %0 : vector<1x128xi32> to vector<64x128xi32>
    %4 = arith.cmpi eq, %2, %3 : vector<64x128xi32>
    %5 = arith.extui %4 : vector<64x128xi1> to vector<64x128xi32>
    %6 = arith.sitofp %5 : vector<64x128xi32> to vector<64x128xf32>
    %7 = arith.truncf %6 : vector<64x128xf32> to vector<64x128xbf16>
    %8 = tpu.iota {dimensions = array<i32: 0>} : vector<128x128xi32>
    %9 = vector.broadcast %1 : vector<1x128xi32> to vector<128x128xi32>
    %10 = arith.cmpi eq, %8, %9 : vector<128x128xi32>
    %11 = arith.extui %10 : vector<128x128xi1> to vector<128x128xi32>
    %12 = arith.sitofp %11 : vector<128x128xi32> to vector<128x128xf32>
    %13 = arith.truncf %12 : vector<128x128xf32> to vector<128x128xbf16>
    %c0_3 = arith.constant 0 : index
    %c0_4 = arith.constant 0 : index
    %14 = vector.load %arg3[%c0_3, %c0_4] : memref<128x64xbf16, #tpu.memory_space<vmem>>, vector<128x64xbf16>
    %cst = arith.constant dense<0.000000e+00> : vector<128x128xf32>
    %15 = tpu.matmul %14, %7, %cst {dimension_numbers = #tpu.dot_dimension_numbers<[1], [0], [0], [1], [0, 0, 1, 1], [], []>} : vector<128x64xbf16>, vector<64x128xbf16>, vector<128x128xf32> -> vector<128x128xf32>
    %c0_5 = arith.constant 0 : index
    %c0_6 = arith.constant 0 : index
    %16 = vector.load %arg4[%c0_5, %c0_6] : memref<128x128xbf16, #tpu.memory_space<vmem>>, vector<128x128xbf16>
    %cst_7 = arith.constant dense<0.000000e+00> : vector<128x128xf32>
    %17 = tpu.matmul %16, %13, %cst_7 {dimension_numbers = #tpu.dot_dimension_numbers<[1], [0], [0], [1], [0, 0, 1, 1], [], []>} : vector<128x128xbf16>, vector<128x128xbf16>, vector<128x128xf32> -> vector<128x128xf32>
    %18 = vector.extract_strided_slice %15 {offsets = [0, 0], sizes = [64, 128], strides = [1, 1]} : vector<128x128xf32> to vector<64x128xf32>
    %19 = vector.extract_strided_slice %15 {offsets = [64, 0], sizes = [64, 128], strides = [1, 1]} : vector<128x128xf32> to vector<64x128xf32>
    %20 = arith.addf %18, %19 : vector<64x128xf32>
    %21 = vector.extract_strided_slice %17 {offsets = [0, 0], sizes = [64, 128], strides = [1, 1]} : vector<128x128xf32> to vector<64x128xf32>
    %22 = vector.extract_strided_slice %17 {offsets = [64, 0], sizes = [64, 128], strides = [1, 1]} : vector<128x128xf32> to vector<64x128xf32>
    %23 = arith.addf %21, %22 : vector<64x128xf32>
    %24 = arith.mulf %20, %23 : vector<64x128xf32>
    %cst_8 = arith.constant dense<0.000000e+00> : vector<128xf32>
    %25 = vector.multi_reduction <add>, %24, %cst_8 [0] : vector<64x128xf32> to vector<128xf32>
    %26 = vector.shape_cast %25 : vector<128xf32> to vector<1x128xf32>
    %c0_9 = arith.constant 0 : index
    %c0_10 = arith.constant 0 : index
    %27 = vector.load %arg5[%c0_9, %c0_10] : memref<1x128xf32, #tpu.memory_space<vmem>>, vector<1x128xf32>
    tpu.vector_store %arg5[%c0_9, %c0_10], %26 {strides = array<i32>} : memref<1x128xf32, #tpu.memory_space<vmem>>, vector<1x128xf32>,
    return
  }
  func.func @transform_0(%arg0: i32) -> (i32, i32) {
    %c0_i32 = arith.constant 0 : i32
    %c0_i32_0 = arith.constant 0 : i32
    return %c0_i32, %arg0 : i32, i32
  }
  func.func @transform_1(%arg0: i32) -> (i32, i32) {
    %c0_i32 = arith.constant 0 : i32
    %c0_i32_0 = arith.constant 0 : i32
    return %c0_i32, %arg0 : i32, i32
  }
  func.func @transform_2(%arg0: i32) -> (i32, i32) {
    %c0_i32 = arith.constant 0 : i32
    %c0_i32_0 = arith.constant 0 : i32
    %c0_i32_1 = arith.constant 0 : i32
    return %c0_i32, %c0_i32_0 : i32, i32
  }
  func.func @transform_3(%arg0: i32) -> (i32, i32) {
    %c0_i32 = arith.constant 0 : i32
    %c0_i32_0 = arith.constant 0 : i32
    %c0_i32_1 = arith.constant 0 : i32
    return %c0_i32, %c0_i32_0 : i32, i32
  }
  func.func @transform_4(%arg0: i32) -> (i32, i32) {
    %c0_i32 = arith.constant 0 : i32
    %c0_i32_0 = arith.constant 0 : i32
    return %c0_i32, %arg0 : i32, i32
  }
}

</mosaic_0001>

<bundles_post_ra>
// kernel: tpu_custom_call.1
= control target key start
LH: loop header
LB: loop body
LE: loop exit
PB: predicated region body
PF: predicated region fallthrough
CT: control target
= control target key end

     0   :  { %v21_v0 = vlaneseq  ;;  %s760_s0 = inlined_call_operand.vmem [shape: s32[1,128], index: 0, kind: input, shape index: {}]   ;;  %s761_s1 = inlined_call_operand.vmem [shape: s32[1,128], index: 1, kind: input, shape index: {}]   ;;  %s762_s2 = inlined_call_operand.vmem [shape: bf16[128,64], index: 2, kind: input, shape index: {}]   ;;  %s763_s3 = inlined_call_operand.vmem [shape: bf16[128,128], index: 3, kind: input, shape index: {}]   ;;  %s764_s4 = inlined_call_operand.hbm [shape: f32[1,128], index: 4, kind: output, shape index: {}]  }
   0x1   :  { %v571_v1 = vld [vmem:[%s760_s0] ss:$0 sm:$0xff] }
   0x2   :  { %v629_v2 = vshrl.u32 %v21_v0, 7  ;;  %v634_v3 = vld [vmem:[%s761_s1] ss:$0 sm:$0xff] }
   0x3   :  { %9 = vsyncpa [#allocation3], 0  ;;  %v599_v12 = vmov 1.0|1.0   ;;  %v541_v20 = vld [vmem:[%s762_s2] sm:$0xff]  ;;  %v546_v21 = vld [vmem:[%s762_s2 + $0x28] sm:$0xff] }
   0x4   :  { %v28_v4 = vadd.s32 48, %v629_v2  ;;  %v29_v5 = vadd.s32 56, %v629_v2  ;;  %v65_v6 = vadd.s32 112, %v629_v2  ;;  %v66_v7 = vadd.s32 120, %v629_v2  ;;  %v542_v22 = vld [vmem:[%s762_s2 + $0x8] sm:$0xff]  ;;  %v547_v23 = vld [vmem:[%s762_s2 + $0x30] sm:$0xff] }
   0x5   :  { %v641_v8 = vadd.s32 32, %v629_v2  ;;  %v644_v9 = vadd.s32 40, %v629_v2  ;;  %v63_v10 = vadd.s32 96, %v629_v2  ;;  %v64_v11 = vadd.s32 104, %v629_v2  ;;  %v553_v24 = vld [vmem:[%s763_s3 + $0x20] sm:$0xff]  ;;  %v543_v26 = vld [vmem:[%s762_s2 + $0x10] sm:$0xff] }
   0x6   :  { %vm37_vm0 = vcmp.eq.s32.totalorder %v28_v4, %v571_v1  ;;  %vm38_vm1 = vcmp.eq.s32.totalorder %v29_v5, %v571_v1  ;;  %vm82_vm2 = vcmp.eq.s32.totalorder %v65_v6, %v634_v3  ;;  %vm83_vm3 = vcmp.eq.s32.totalorder %v66_v7, %v634_v3  ;;  %v549_v25 = vld [vmem:[%s763_s3] sm:$0xff]  ;;  %v548_v27 = vld [vmem:[%s762_s2 + $0x38] sm:$0xff]  ;;  %v554_v28 = vld [vmem:[%s763_s3 + $0x28] sm:$0xff]  ;;  %s412_s23 = sshll.u32 %s764_s4, 4  ;;  %s413_s23 = int_to_ptr.hbm [resolvable:$true] %s412_s23 }
   0x7   :  { %vm477_vm4 = vmpackc.low %vm38_vm1, %vm37_vm0  ;;  %vm35_vm5 = vcmp.eq.s32.totalorder %v641_v8, %v571_v1  ;;  %vm36_vm6 = vcmp.eq.s32.totalorder %v644_v9, %v571_v1  ;;  %vm80_vm7 = vcmp.eq.s32.totalorder %v63_v10, %v634_v3  ;;  %vm81_vm8 = vcmp.eq.s32.totalorder %v64_v11, %v634_v3  ;;  %v550_v29 = vld [vmem:[%s763_s3 + $0x8] sm:$0xff]  ;;  %v544_v30 = vld [vmem:[%s762_s2 + $0x18] sm:$0xff] }
   0x8   :  { %478 = vmatpush.bf16.msk.msra.mxu0 %vm477_vm4, %v599_v12  ;;  %vm525_vm9 = vmpackc.low %vm83_vm3, %vm82_vm2  ;;  %v24_v13 = vadd.s32 16, %v629_v2  ;;  %v25_v14 = vadd.s32 24, %v629_v2  ;;  %v61_v15 = vadd.s32 80, %v629_v2  ;;  %v62_v16 = vadd.s32 88, %v629_v2  ;;  %557 = vmatpush.bf16.msk.msra.mxu3 %vm477_vm4, %v599_v12  ;;  %v555_v31 = vld [vmem:[%s763_s3 + $0x30] sm:$0xff]  ;;  %v545_v33 = vld [vmem:[%s762_s2 + $0x20] sm:$0xff] }
   0x9   :  { %561 = vmatpush.bf16.msk.msra.mxu2 %vm525_vm9, %v599_v12  ;;  %vm479_vm10 = vmpackc.low %vm36_vm6, %vm35_vm5  ;;  %526 = vmatpush.bf16.msk.msra.mxu1 %vm525_vm9, %v599_v12  ;;  %v23_v17 = vadd.s32 8, %v629_v2  ;;  %v59_v18 = vadd.s32 64, %v629_v2  ;;  %v60_v19 = vadd.s32 72, %v629_v2  ;;  %vm31_vm2 = vcmp.eq.s32.totalorder %v629_v2, %v571_v1  ;;  %v551_v32 = vld [vmem:[%s763_s3 + $0x10] sm:$0xff]  ;;  %v556_v34 = vld [vmem:[%s763_s3 + $0x38] sm:$0xff]  ;;  %s600_s2 = smov [#allocation2]  }
   0xa   :  { %vm527_vm11 = vmpackc.low %vm81_vm8, %vm80_vm7  ;;  %vm33_vm12 = vcmp.eq.s32.totalorder %v24_v13, %v571_v1  ;;  %vm34_vm13 = vcmp.eq.s32.totalorder %v25_v14, %v571_v1  ;;  %vm78_vm14 = vcmp.eq.s32.totalorder %v61_v15, %v634_v3  ;;  %vm79_vm15 = vcmp.eq.s32.totalorder %v62_v16, %v634_v3  ;;  %v552_v35 = vld [vmem:[%s763_s3 + $0x18] sm:$0xff]  ;;  %s410_s3 = sshll.u32 %s600_s2, 4  ;;  %s411_s3 = int_to_ptr.vmem [resolvable:$true] %s410_s3 }
   0xb   :  { %vm481_vm0 = vmpackc.low %vm34_vm13, %vm33_vm12  ;;  %vm32_vm3 = vcmp.eq.s32.totalorder %v23_v17, %v571_v1  ;;  %vm76_vm4 = vcmp.eq.s32.totalorder %v59_v18, %v634_v3  ;;  %vm77_vm5 = vcmp.eq.s32.totalorder %v60_v19, %v634_v3  ;;  %vm74_vm8 = vcmp.eq.s32.totalorder %v28_v4, %v634_v3 }
   0xc   :  { %480 = vmatpush.bf16.msk.msra.mxu0 %vm479_vm10, %v599_v12  ;;  %558 = vmatpush.bf16.msk.msra.mxu3 %vm479_vm10, %v599_v12  ;;  %vm529_vm1 = vmpackc.low %vm79_vm15, %vm78_vm14  ;;  %vm75_vm9 = vcmp.eq.s32.totalorder %v29_v5, %v634_v3  ;;  %vm180_vm10 = vcmask 523264   ;;  %vm72_vm12 = vcmp.eq.s32.totalorder %v641_v8, %v634_v3  ;;  %vm73_vm13 = vcmp.eq.s32.totalorder %v644_v9, %v634_v3 }
   0xd   :  { %562 = vmatpush.bf16.msk.msra.mxu2 %vm527_vm11, %v599_v12  ;;  %528 = vmatpush.bf16.msk.msra.mxu1 %vm527_vm11, %v599_v12  ;;  %vm483_vm6 = vmpackc.low %vm32_vm3, %vm31_vm2  ;;  %vm70_vm15 = vcmp.eq.s32.totalorder %v24_v13, %v634_v3  ;;  %vm68_vm2 = vcmp.eq.s32.totalorder %v629_v2, %v634_v3  ;;  %vm69_vm3 = vcmp.eq.s32.totalorder %v23_v17, %v634_v3 }
   0xe   :  { %vm531_vm7 = vmpackc.low %vm77_vm5, %vm76_vm4 }
   0xf   :  { %vm533_vm11 = vmpackc.low %vm75_vm9, %vm74_vm8 }
  0x10   :  { %482 = vmatpush.bf16.msk.msra.mxu0 %vm481_vm0, %v599_v12  ;;  %559 = vmatpush.bf16.msk.msra.mxu3 %vm481_vm0, %v599_v12  ;;  %vm535_vm14 = vmpackc.low %vm73_vm13, %vm72_vm12  ;;  %vm71_vm0 = vcmp.eq.s32.totalorder %v25_v14, %v634_v3 }
  0x11   :  { %563 = vmatpush.bf16.msk.msra.mxu2 %vm529_vm1, %v599_v12  ;;  %530 = vmatpush.bf16.msk.msra.mxu1 %vm529_vm1, %v599_v12  ;;  %vm537_vm1 = vmpackc.low %vm71_vm0, %vm70_vm15 }
  0x12   :  { %vm539_vm4 = vmpackc.low %vm69_vm3, %vm68_vm2 }
  0x14   :  { %484 = vmatpush.bf16.msk.msra.mxu0 %vm483_vm6, %v599_v12  ;;  %560 = vmatpush.bf16.msk.msra.mxu3 %vm483_vm6, %v599_v12 }
  0x15   :  { %564 = vmatpush.bf16.msk.msra.mxu2 %vm531_vm7, %v599_v12  ;;  %532 = vmatpush.bf16.msk.msra.mxu1 %vm531_vm7, %v599_v12 }
  0x17   :  { %485 = vmatmul.msk.bf16.vlgmr.msra.gmra.mxu0 %vm180_vm10, %v541_v20  ;;  %490 = vmatmul.msk.bf16.vlgmr.msra.gmra.mxu3 %vm180_vm10, %v546_v21 }
  0x19   :  { %565 = vmatpush.bf16.msk.msra.mxu2 %vm533_vm11, %v599_v12  ;;  %534 = vmatpush.bf16.msk.msra.mxu1 %vm533_vm11, %v599_v12 }
  0x1d   :  { %566 = vmatpush.bf16.msk.msra.mxu2 %vm535_vm14, %v599_v12  ;;  %536 = vmatpush.bf16.msk.msra.mxu1 %vm535_vm14, %v599_v12 }
  0x21   :  { %567 = vmatpush.bf16.msk.msra.mxu2 %vm537_vm1, %v599_v12  ;;  %538 = vmatpush.bf16.msk.msra.mxu1 %vm537_vm1, %v599_v12 }
  0x25   :  { %568 = vmatpush.bf16.msk.msra.mxu2 %vm539_vm4, %v599_v12  ;;  %540 = vmatpush.bf16.msk.msra.mxu1 %vm539_vm4, %v599_v12 }
  0x27   :  { %486 = vmatmul.msk.bf16.gmra.mxu0 %vm180_vm10, %v542_v22  ;;  %491 = vmatmul.msk.bf16.gmra.mxu3 %vm180_vm10, %v547_v23 }
  0x28   :  { %346 = vmatmul.bf16.vlgmr.msra.gmra.mxu2 %v553_v24  ;;  %326 = vmatmul.bf16.vlgmr.msra.gmra.mxu1 %v549_v25 }
  0x37   :  { %487 = vmatmul.msk.bf16.gmra.mxu0 %vm180_vm10, %v543_v26  ;;  %492 = vmatmul.msk.bf16.gmra.mxu3 %vm180_vm10, %v548_v27 }
  0x38   :  { %351 = vmatmul.bf16.gmra.mxu2 %v554_v28  ;;  %331 = vmatmul.bf16.gmra.mxu1 %v550_v29 }
  0x47   :  { %488 = vmatmul.msk.bf16.gmra.mxu0 %vm180_vm10, %v544_v30 }
  0x48   :  { %356 = vmatmul.bf16.gmra.mxu2 %v555_v31  ;;  %336 = vmatmul.bf16.gmra.mxu1 %v551_v32 }
  0x57   :  { %489 = vmatmul.msk.bf16.gmra.mxu0 %vm180_vm10, %v545_v33 }
  0x58   :  { %361 = vmatmul.bf16.gmra.mxu2 %v556_v34  ;;  %341 = vmatmul.bf16.gmra.mxu1 %v552_v35 }
  0x94   :  { %v214_v36 = vpop.f32.mrf.mxu0 }
  0x9a   :  { %v239_v43 = vpop.f32.mrf.mxu3 }
  0x9c   :  { %v216_v37 = vpop.f32.mrf.mxu0 }
  0xa2   :  { %v241_v49 = vpop.f32.mrf.mxu3 }
  0xa4   :  { %v219_v38 = vpop.f32.mrf.mxu0 }
  0xa5   :  { %v327_v39 = vpop.f32.mrf.mxu1  ;;  %v369_v6 = vadd.f32 %v239_v43, %v219_v38 }
  0xaa   :  { %v244_v53 = vpop.f32.mrf.mxu3 }
  0xab   :  { %v347_v40 = vpop.f32.mrf.mxu2 }
  0xac   :  { %v221_v41 = vpop.f32.mrf.mxu0  ;;  %v375_v2 = vadd.f32 %v347_v40, %v327_v39 }
  0xad   :  { %v329_v42 = vpop.f32.mrf.mxu1  ;;  %v370_v10 = vadd.f32 %v241_v49, %v221_v41 }
  0xb2   :  { %v246_v57 = vpop.f32.mrf.mxu3 }
  0xb3   :  { %v349_v44 = vpop.f32.mrf.mxu2 }
  0xb4   :  { %v224_v45 = vpop.f32.mrf.mxu0  ;;  %v376_v3 = vadd.f32 %v349_v44, %v329_v42 }
  0xb5   :  { %v332_v46 = vpop.f32.mrf.mxu1  ;;  %v371_v14 = vadd.f32 %v244_v53, %v224_v45 }
  0xba   :  { %v249_v61 = vpop.f32.mrf.mxu3 }
  0xbb   :  { %v352_v47 = vpop.f32.mrf.mxu2 }
  0xbc   :  { %v226_v48 = vpop.f32.mrf.mxu0  ;;  %v377_v4 = vadd.f32 %v352_v47, %v332_v46 }
  0xbd   :  { %v334_v50 = vpop.f32.mrf.mxu1  ;;  %v372_v19 = vadd.f32 %v246_v57, %v226_v48 }
  0xbe   :  { %v385_v11 = vmul.f32 %v377_v4, %v369_v6 }
  0xc2   :  { %v251_v23 = vpop.f32.mrf.mxu3 }
  0xc3   :  { %v354_v51 = vpop.f32.mrf.mxu2 }
  0xc4   :  { %v229_v52 = vpop.f32.mrf.mxu0  ;;  %v378_v7 = vadd.f32 %v354_v51, %v334_v50 }
  0xc5   :  { %v337_v54 = vpop.f32.mrf.mxu1  ;;  %v373_v25 = vadd.f32 %v249_v61, %v229_v52 }
  0xc6   :  { %v386_v15 = vmul.f32 %v378_v7, %v370_v10 }
  0xcb   :  { %v357_v55 = vpop.f32.mrf.mxu2 }
  0xcc   :  { %v231_v56 = vpop.f32.mrf.mxu0  ;;  %v379_v12 = vadd.f32 %v357_v55, %v337_v54 }
  0xcd   :  { %v339_v58 = vpop.f32.mrf.mxu1  ;;  %v374_v29 = vadd.f32 %v251_v23, %v231_v56 }
  0xce   :  { %v387_v20 = vmul.f32 %v379_v12, %v371_v14 }
  0xd3   :  { %v359_v59 = vpop.f32.mrf.mxu2 }
  0xd4   :  { %v234_v60 = vpop.f32.mrf.mxu0  ;;  %v380_v16 = vadd.f32 %v359_v59, %v339_v58 }
  0xd5   :  { %v367_v62 = vadd.f32 %v234_v60, %v214_v36  ;;  %v342_v0 = vpop.f32.mrf.mxu1 }
  0xd6   :  { %v388_v26 = vmul.f32 %v380_v16, %v372_v19 }
  0xd7   :  { %v383_v8 = vmul.f32 %v375_v2, %v367_v62 }
  0xdb   :  { %v362_v63 = vpop.f32.mrf.mxu2 }
  0xdc   :  { %v236_v1 = vpop.f32.mrf.mxu0  ;;  %v381_v21 = vadd.f32 %v362_v63, %v342_v0 }
  0xdd   :  { %v368_v5 = vadd.f32 %v236_v1, %v216_v37  ;;  %v344_v24 = vpop.f32.mrf.mxu1 }
  0xde   :  { %v389_v30 = vmul.f32 %v381_v21, %v373_v25 }
  0xdf   :  { %v384_v9 = vmul.f32 %v376_v3, %v368_v5 }
  0xe1   :  { %v391_v13 = vadd.f32 %v384_v9, %v383_v8 }
  0xe3   :  { %v392_v17 = vadd.f32 %v391_v13, %v385_v11  ;;  %v364_v18 = vpop.f32.mrf.mxu2 }
  0xe4   :  { %v382_v27 = vadd.f32 %v364_v18, %v344_v24 }
  0xe5   :  { %v393_v22 = vadd.f32 %v392_v17, %v386_v15 }
  0xe6   :  { %v390_v32 = vmul.f32 %v382_v27, %v374_v29 }
  0xe7   :  { %v394_v28 = vadd.f32 %v393_v22, %v387_v20 }
  0xe9   :  { %v395_v31 = vadd.f32 %v394_v28, %v388_v26 }
  0xeb   :  { %v396_v33 = vadd.f32 %v395_v31, %v389_v30 }
  0xed   :  { %v397_v34 = vadd.f32 %v396_v33, %v390_v32 }
  0xef   :  { %v398_v35 = vrot.slane %v397_v34, 4 }
  0xf1   :  { %v399_v36 = vadd.f32 %v398_v35, %v397_v34 }
  0xf3   :  { %v400_v37 = vrot.slane %v399_v36, 2 }
  0xf5   :  { %v401_v38 = vadd.f32 %v400_v37, %v399_v36 }
  0xf7   :  { %v402_v39 = vrot.slane %v401_v38, 1 }
  0xf9   :  { %v403_v40 = vadd.f32 %v402_v39, %v401_v38 }
  0xfb   :  { %404 = vst [vmem:[#allocation2] sm:$0x1] %v403_v40 }
  0xfc   :  { %415 = dma.vmem_to_hbm [thread:$0]  %s411_s3, 16, %s413_s23, [#allocation3]  }
  0xfd   :  { %597 = dma.done.wait [#allocation3], 16  }
  0xfe   :  { %598 = vsyncadd [#allocation3], 4294967280 }
  0xff   :  { %420 = vsyncpa [#allocation3], 1 }

// kernel: tpu_custom_call.1
= control target key start
LH: loop header
LB: loop body
LE: loop exit
PB: predicated region body
PF: predicated region fallthrough
CT: control target
= control target key end

     0   :  { %v21_v0 = vlaneseq  ;;  %s760_s0 = inlined_call_operand.vmem [shape: s32[1,128], index: 0, kind: input, shape index: {}]   ;;  %s761_s1 = inlined_call_operand.vmem [shape: s32[1,128], index: 1, kind: input, shape index: {}]   ;;  %s762_s2 = inlined_call_operand.vmem [shape: bf16[128,64], index: 2, kind: input, shape index: {}]   ;;  %s763_s3 = inlined_call_operand.vmem [shape: bf16[128,128], index: 3, kind: input, shape index: {}]   ;;  %s764_s4 = inlined_call_operand.hbm [shape: f32[1,128], index: 4, kind: output, shape index: {}]  }
   0x1   :  { %v571_v1 = vld [vmem:[%s760_s0] ss:$0 sm:$0xff] }
   0x2   :  { %v629_v2 = vshrl.u32 %v21_v0, 7  ;;  %v634_v3 = vld [vmem:[%s761_s1] ss:$0 sm:$0xff] }
   0x3   :  { %9 = vsyncpa [#allocation3], 0  ;;  %v599_v12 = vmov 1.0|1.0   ;;  %v541_v20 = vld [vmem:[%s762_s2] sm:$0xff]  ;;  %v546_v21 = vld [vmem:[%s762_s2 + $0x28] sm:$0xff] }
   0x4   :  { %v28_v4 = vadd.s32 48, %v629_v2  ;;  %v29_v5 = vadd.s32 56, %v629_v2  ;;  %v65_v6 = vadd.s32 112, %v629_v2  ;;  %v66_v7 = vadd.s32 120, %v629_v2  ;;  %v542_v22 = vld [vmem:[%s762_s2 + $0x8] sm:$0xff]  ;;  %v547_v23 = vld [vmem:[%s762_s2 + $0x30] sm:$0xff] }
   0x5   :  { %v641_v8 = vadd.s32 32, %v629_v2  ;;  %v644_v9 = vadd.s32 40, %v629_v2  ;;  %v63_v10 = vadd.s32 96, %v629_v2  ;;  %v64_v11 = vadd.s32 104, %v629_v2  ;;  %v553_v24 = vld [vmem:[%s763_s3 + $0x20] sm:$0xff]  ;;  %v543_v26 = vld [vmem:[%s762_s2 + $0x10] sm:$0xff] }
   0x6   :  { %vm37_vm0 = vcmp.eq.s32.totalorder %v28_v4, %v571_v1  ;;  %vm38_vm1 = vcmp.eq.s32.totalorder %v29_v5, %v571_v1  ;;  %vm82_vm2 = vcmp.eq.s32.totalorder %v65_v6, %v634_v3  ;;  %vm83_vm3 = vcmp.eq.s32.totalorder %v66_v7, %v634_v3  ;;  %v549_v25 = vld [vmem:[%s763_s3] sm:$0xff]  ;;  %v548_v27 = vld [vmem:[%s762_s2 + $0x38] sm:$0xff]  ;;  %v554_v28 = vld [vmem:[%s763_s3 + $0x28] sm:$0xff]  ;;  %s412_s23 = sshll.u32 %s764_s4, 4  ;;  %s413_s23 = int_to_ptr.hbm [resolvable:$true] %s412_s23 }
   0x7   :  { %vm477_vm4 = vmpackc.low %vm38_vm1, %vm37_vm0  ;;  %vm35_vm5 = vcmp.eq.s32.totalorder %v641_v8, %v571_v1  ;;  %vm36_vm6 = vcmp.eq.s32.totalorder %v644_v9, %v571_v1  ;;  %vm80_vm7 = vcmp.eq.s32.totalorder %v63_v10, %v634_v3  ;;  %vm81_vm8 = vcmp.eq.s32.totalorder %v64_v11, %v634_v3  ;;  %v550_v29 = vld [vmem:[%s763_s3 + $0x8] sm:$0xff]  ;;  %v544_v30 = vld [vmem:[%s762_s2 + $0x18] sm:$0xff] }
   0x8   :  { %478 = vmatpush.bf16.msk.msra.mxu0 %vm477_vm4, %v599_v12  ;;  %vm525_vm9 = vmpackc.low %vm83_vm3, %vm82_vm2  ;;  %v24_v13 = vadd.s32 16, %v629_v2  ;;  %v25_v14 = vadd.s32 24, %v629_v2  ;;  %v61_v15 = vadd.s32 80, %v629_v2  ;;  %v62_v16 = vadd.s32 88, %v629_v2  ;;  %557 = vmatpush.bf16.msk.msra.mxu3 %vm477_vm4, %v599_v12  ;;  %v555_v31 = vld [vmem:[%s763_s3 + $0x30] sm:$0xff]  ;;  %v545_v33 = vld [vmem:[%s762_s2 + $0x20] sm:$0xff] }
   0x9   :  { %561 = vmatpush.bf16.msk.msra.mxu2 %vm525_vm9, %v599_v12  ;;  %vm479_vm10 = vmpackc.low %vm36_vm6, %vm35_vm5  ;;  %526 = vmatpush.bf16.msk.msra.mxu1 %vm525_vm9, %v599_v12  ;;  %v23_v17 = vadd.s32 8, %v629_v2  ;;  %v59_v18 = vadd.s32 64, %v629_v2  ;;  %v60_v19 = vadd.s32 72, %v629_v2  ;;  %vm31_vm2 = vcmp.eq.s32.totalorder %v629_v2, %v571_v1  ;;  %v551_v32 = vld [vmem:[%s763_s3 + $0x10] sm:$0xff]  ;;  %v556_v34 = vld [vmem:[%s763_s3 + $0x38] sm:$0xff]  ;;  %s600_s2 = smov [#allocation2]  }
   0xa   :  { %vm527_vm11 = vmpackc.low %vm81_vm8, %vm80_vm7  ;;  %vm33_vm12 = vcmp.eq.s32.totalorder %v24_v13, %v571_v1  ;;  %vm34_vm13 = vcmp.eq.s32.totalorder %v25_v14, %v571_v1  ;;  %vm78_vm14 = vcmp.eq.s32.totalorder %v61_v15, %v634_v3  ;;  %vm79_vm15 = vcmp.eq.s32.totalorder %v62_v16, %v634_v3  ;;  %v552_v35 = vld [vmem:[%s763_s3 + $0x18] sm:$0xff]  ;;  %s410_s3 = sshll.u32 %s600_s2, 4  ;;  %s411_s3 = int_to_ptr.vmem [resolvable:$true] %s410_s3 }
   0xb   :  { %vm481_vm0 = vmpackc.low %vm34_vm13, %vm33_vm12  ;;  %vm32_vm3 = vcmp.eq.s32.totalorder %v23_v17, %v571_v1  ;;  %vm76_vm4 = vcmp.eq.s32.totalorder %v59_v18, %v634_v3  ;;  %vm77_vm5 = vcmp.eq.s32.totalorder %v60_v19, %v634_v3  ;;  %vm74_vm8 = vcmp.eq.s32.totalorder %v28_v4, %v634_v3 }
   0xc   :  { %480 = vmatpush.bf16.msk.msra.mxu0 %vm479_vm10, %v599_v12  ;;  %558 = vmatpush.bf16.msk.msra.mxu3 %vm479_vm10, %v599_v12  ;;  %vm529_vm1 = vmpackc.low %vm79_vm15, %vm78_vm14  ;;  %vm75_vm9 = vcmp.eq.s32.totalorder %v29_v5, %v634_v3  ;;  %vm180_vm10 = vcmask 523264   ;;  %vm72_vm12 = vcmp.eq.s32.totalorder %v641_v8, %v634_v3  ;;  %vm73_vm13 = vcmp.eq.s32.totalorder %v644_v9, %v634_v3 }
   0xd   :  { %562 = vmatpush.bf16.msk.msra.mxu2 %vm527_vm11, %v599_v12  ;;  %528 = vmatpush.bf16.msk.msra.mxu1 %vm527_vm11, %v599_v12  ;;  %vm483_vm6 = vmpackc.low %vm32_vm3, %vm31_vm2  ;;  %vm70_vm15 = vcmp.eq.s32.totalorder %v24_v13, %v634_v3  ;;  %vm68_vm2 = vcmp.eq.s32.totalorder %v629_v2, %v634_v3  ;;  %vm69_vm3 = vcmp.eq.s32.totalorder %v23_v17, %v634_v3 }
   0xe   :  { %vm531_vm7 = vmpackc.low %vm77_vm5, %vm76_vm4 }
   0xf   :  { %vm533_vm11 = vmpackc.low %vm75_vm9, %vm74_vm8 }
  0x10   :  { %482 = vmatpush.bf16.msk.msra.mxu0 %vm481_vm0, %v599_v12  ;;  %559 = vmatpush.bf16.msk.msra.mxu3 %vm481_vm0, %v599_v12  ;;  %vm535_vm14 = vmpackc.low %vm73_vm13, %vm72_vm12  ;;  %vm71_vm0 = vcmp.eq.s32.totalorder %v25_v14, %v634_v3 }
  0x11   :  { %563 = vmatpush.bf16.msk.msra.mxu2 %vm529_vm1, %v599_v12  ;;  %530 = vmatpush.bf16.msk.msra.mxu1 %vm529_vm1, %v599_v12  ;;  %vm537_vm1 = vmpackc.low %vm71_vm0, %vm70_vm15 }
  0x12   :  { %vm539_vm4 = vmpackc.low %vm69_vm3, %vm68_vm2 }
  0x14   :  { %484 = vmatpush.bf16.msk.msra.mxu0 %vm483_vm6, %v599_v12  ;;  %560 = vmatpush.bf16.msk.msra.mxu3 %vm483_vm6, %v599_v12 }
  0x15   :  { %564 = vmatpush.bf16.msk.msra.mxu2 %vm531_vm7, %v599_v12  ;;  %532 = vmatpush.bf16.msk.msra.mxu1 %vm531_vm7, %v599_v12 }
  0x17   :  { %485 = vmatmul.msk.bf16.vlgmr.msra.gmra.mxu0 %vm180_vm10, %v541_v20  ;;  %490 = vmatmul.msk.bf16.vlgmr.msra.gmra.mxu3 %vm180_vm10, %v546_v21 }
  0x19   :  { %565 = vmatpush.bf16.msk.msra.mxu2 %vm533_vm11, %v599_v12  ;;  %534 = vmatpush.bf16.msk.msra.mxu1 %vm533_vm11, %v599_v12 }
  0x1d   :  { %566 = vmatpush.bf16.msk.msra.mxu2 %vm535_vm14, %v599_v12  ;;  %536 = vmatpush.bf16.msk.msra.mxu1 %vm535_vm14, %v599_v12 }
  0x21   :  { %567 = vmatpush.bf16.msk.msra.mxu2 %vm537_vm1, %v599_v12  ;;  %538 = vmatpush.bf16.msk.msra.mxu1 %vm537_vm1, %v599_v12 }
  0x25   :  { %568 = vmatpush.bf16.msk.msra.mxu2 %vm539_vm4, %v599_v12  ;;  %540 = vmatpush.bf16.msk.msra.mxu1 %vm539_vm4, %v599_v12 }
  0x27   :  { %486 = vmatmul.msk.bf16.gmra.mxu0 %vm180_vm10, %v542_v22  ;;  %491 = vmatmul.msk.bf16.gmra.mxu3 %vm180_vm10, %v547_v23 }
  0x28   :  { %346 = vmatmul.bf16.vlgmr.msra.gmra.mxu2 %v553_v24  ;;  %326 = vmatmul.bf16.vlgmr.msra.gmra.mxu1 %v549_v25 }
  0x37   :  { %487 = vmatmul.msk.bf16.gmra.mxu0 %vm180_vm10, %v543_v26  ;;  %492 = vmatmul.msk.bf16.gmra.mxu3 %vm180_vm10, %v548_v27 }
  0x38   :  { %351 = vmatmul.bf16.gmra.mxu2 %v554_v28  ;;  %331 = vmatmul.bf16.gmra.mxu1 %v550_v29 }
  0x47   :  { %488 = vmatmul.msk.bf16.gmra.mxu0 %vm180_vm10, %v544_v30 }
  0x48   :  { %356 = vmatmul.bf16.gmra.mxu2 %v555_v31  ;;  %336 = vmatmul.bf16.gmra.mxu1 %v551_v32 }
  0x57   :  { %489 = vmatmul.msk.bf16.gmra.mxu0 %vm180_vm10, %v545_v33 }
  0x58   :  { %361 = vmatmul.bf16.gmra.mxu2 %v556_v34  ;;  %341 = vmatmul.bf16.gmra.mxu1 %v552_v35 }
  0x94   :  { %v214_v36 = vpop.f32.mrf.mxu0 }
  0x9a   :  { %v239_v43 = vpop.f32.mrf.mxu3 }
  0x9c   :  { %v216_v37 = vpop.f32.mrf.mxu0 }
  0xa2   :  { %v241_v49 = vpop.f32.mrf.mxu3 }
  0xa4   :  { %v219_v38 = vpop.f32.mrf.mxu0 }
  0xa5   :  { %v327_v39 = vpop.f32.mrf.mxu1  ;;  %v369_v6 = vadd.f32 %v239_v43, %v219_v38 }
  0xaa   :  { %v244_v53 = vpop.f32.mrf.mxu3 }
  0xab   :  { %v347_v40 = vpop.f32.mrf.mxu2 }
  0xac   :  { %v221_v41 = vpop.f32.mrf.mxu0  ;;  %v375_v2 = vadd.f32 %v347_v40, %v327_v39 }
  0xad   :  { %v329_v42 = vpop.f32.mrf.mxu1  ;;  %v370_v10 = vadd.f32 %v241_v49, %v221_v41 }
  0xb2   :  { %v246_v57 = vpop.f32.mrf.mxu3 }
  0xb3   :  { %v349_v44 = vpop.f32.mrf.mxu2 }
  0xb4   :  { %v224_v45 = vpop.f32.mrf.mxu0  ;;  %v376_v3 = vadd.f32 %v349_v44, %v329_v42 }
  0xb5   :  { %v332_v46 = vpop.f32.mrf.mxu1  ;;  %v371_v14 = vadd.f32 %v244_v53, %v224_v45 }
  0xba   :  { %v249_v61 = vpop.f32.mrf.mxu3 }
  0xbb   :  { %v352_v47 = vpop.f32.mrf.mxu2 }
  0xbc   :  { %v226_v48 = vpop.f32.mrf.mxu0  ;;  %v377_v4 = vadd.f32 %v352_v47, %v332_v46 }
  0xbd   :  { %v334_v50 = vpop.f32.mrf.mxu1  ;;  %v372_v19 = vadd.f32 %v246_v57, %v226_v48 }
  0xbe   :  { %v385_v11 = vmul.f32 %v377_v4, %v369_v6 }
  0xc2   :  { %v251_v23 = vpop.f32.mrf.mxu3 }
  0xc3   :  { %v354_v51 = vpop.f32.mrf.mxu2 }
  0xc4   :  { %v229_v52 = vpop.f32.mrf.mxu0  ;;  %v378_v7 = vadd.f32 %v354_v51, %v334_v50 }
  0xc5   :  { %v337_v54 = vpop.f32.mrf.mxu1  ;;  %v373_v25 = vadd.f32 %v249_v61, %v229_v52 }
  0xc6   :  { %v386_v15 = vmul.f32 %v378_v7, %v370_v10 }
  0xcb   :  { %v357_v55 = vpop.f32.mrf.mxu2 }
  0xcc   :  { %v231_v56 = vpop.f32.mrf.mxu0  ;;  %v379_v12 = vadd.f32 %v357_v55, %v337_v54 }
  0xcd   :  { %v339_v58 = vpop.f32.mrf.mxu1  ;;  %v374_v29 = vadd.f32 %v251_v23, %v231_v56 }
  0xce   :  { %v387_v20 = vmul.f32 %v379_v12, %v371_v14 }
  0xd3   :  { %v359_v59 = vpop.f32.mrf.mxu2 }
  0xd4   :  { %v234_v60 = vpop.f32.mrf.mxu0  ;;  %v380_v16 = vadd.f32 %v359_v59, %v339_v58 }
  0xd5   :  { %v367_v62 = vadd.f32 %v234_v60, %v214_v36  ;;  %v342_v0 = vpop.f32.mrf.mxu1 }
  0xd6   :  { %v388_v26 = vmul.f32 %v380_v16, %v372_v19 }
  0xd7   :  { %v383_v8 = vmul.f32 %v375_v2, %v367_v62 }
  0xdb   :  { %v362_v63 = vpop.f32.mrf.mxu2 }
  0xdc   :  { %v236_v1 = vpop.f32.mrf.mxu0  ;;  %v381_v21 = vadd.f32 %v362_v63, %v342_v0 }
  0xdd   :  { %v368_v5 = vadd.f32 %v236_v1, %v216_v37  ;;  %v344_v24 = vpop.f32.mrf.mxu1 }
  0xde   :  { %v389_v30 = vmul.f32 %v381_v21, %v373_v25 }
  0xdf   :  { %v384_v9 = vmul.f32 %v376_v3, %v368_v5 }
  0xe1   :  { %v391_v13 = vadd.f32 %v384_v9, %v383_v8 }
  0xe3   :  { %v392_v17 = vadd.f32 %v391_v13, %v385_v11  ;;  %v364_v18 = vpop.f32.mrf.mxu2 }
  0xe4   :  { %v382_v27 = vadd.f32 %v364_v18, %v344_v24 }
  0xe5   :  { %v393_v22 = vadd.f32 %v392_v17, %v386_v15 }
  0xe6   :  { %v390_v32 = vmul.f32 %v382_v27, %v374_v29 }
  0xe7   :  { %v394_v28 = vadd.f32 %v393_v22, %v387_v20 }
  0xe9   :  { %v395_v31 = vadd.f32 %v394_v28, %v388_v26 }
  0xeb   :  { %v396_v33 = vadd.f32 %v395_v31, %v389_v30 }
  0xed   :  { %v397_v34 = vadd.f32 %v396_v33, %v390_v32 }
  0xef   :  { %v398_v35 = vrot.slane %v397_v34, 4 }
  0xf1   :  { %v399_v36 = vadd.f32 %v398_v35, %v397_v34 }
  0xf3   :  { %v400_v37 = vrot.slane %v399_v36, 2 }
  0xf5   :  { %v401_v38 = vadd.f32 %v400_v37, %v399_v36 }
  0xf7   :  { %v402_v39 = vrot.slane %v401_v38, 1 }
  0xf9   :  { %v403_v40 = vadd.f32 %v402_v39, %v401_v38 }
  0xfb   :  { %404 = vst [vmem:[#allocation2] sm:$0x1] %v403_v40 }
  0xfc   :  { %415 = dma.vmem_to_hbm [thread:$0]  %s411_s3, 16, %s413_s23, [#allocation3]  }
  0xfd   :  { %597 = dma.done.wait [#allocation3], 16  }
  0xfe   :  { %598 = vsyncadd [#allocation3], 4294967280 }
  0xff   :  { %420 = vsyncpa [#allocation3], 1 }

</bundles_post_ra>
